<compile_context>
chip_gen: v7x
topology: tpu7x:2x2x1
jax: 0.10.0
libtpu: 0.0.40
codegen_flags: <defaults>
</compile_context>

<pallas_src>
import math

import jax
import jax.numpy as jnp
import numpy as np
from jax import lax
from jax.experimental import pallas as pl
from jax.experimental.pallas import tpu as pltpu


def _round_up(v, m):
    return ((v + m - 1) // m) * m


def _hardswish(y):
    # x * relu6(x + 3) / 6
    return y * jnp.minimum(jnp.maximum(y + 3.0, 0.0), 6.0) * (1.0 / 6.0)


def _pick_row_tile(Ho, Wo, target_rows):
    """Output-row tile TH such that TH*Wo (matmul M / store sublane dim) % 8 == 0."""
    unit = 8 // math.gcd(Wo, 8)
    th = max(unit, (max(target_rows // Wo, 1) // unit) * unit)
    th = min(th, _round_up(Ho, unit))
    return th


def _vmem_limit_bytes():
    # Raise the scoped-VMEM cap where we can query physical capacity (v5e/v6e: 128 MiB,
    # v7x: 64 MiB); fall back to the compiler default if the query is unavailable.
    try:
        cap = pltpu.get_tpu_info().vmem_capacity_bytes
        return min(int(cap * 3 // 4), 96 * 1024 * 1024)
    except Exception:
        return None


# ------------------------- fused Pallas kernel -------------------------

def _make_fused_kernel(k, s, TH, Wo, C1):
    """Depthwise kxk/stride-s conv + BN1 bias + hardswish fused with the pointwise
    1x1 conv (MXU matmul) + BN2 bias + hardswish.

    refs: x6_ref (1, s, s, Hq, Wq, C1) bf16   -- space-to-depth padded input (resident)
          wd_ref (k*k, C1) f32, bd_ref (1, C1) f32        -- DW weight / bias (BN folded)
          wp_ref (C1, Cp2) bf16, bp_ref (1, Cp2) f32      -- PW weight / bias (BN folded)
          o_ref  (1, TH*Wo, Cp2) f32
    Every DW tap is a unit-stride slice: sub-grid (a%s, b%s), row offset a//s, col
    offset b//s.  All k*k taps are full-lane-width VPU multiply-adds.
    """
    def kernel(x6_ref, wd_ref, bd_ref, wp_ref, bp_ref, o_ref):
        r0 = pl.program_id(1) * TH                       # first output row of this tile
        acc = None
        for a in range(k):
            for b in range(k):
                pr, a2 = a % s, a // s
                pc, b2 = b % s, b // s
                tap = x6_ref[0, pr, pc, pl.ds(r0 + a2, TH), b2:b2 + Wo, :]
                term = tap.astype(jnp.float32) * wd_ref[a * k + b, :]
                acc = term if acc is None else acc + term
        y = _hardswish(acc + bd_ref[0, :])               # (TH, Wo, C1) f32, stays in VMEM
        lhs = y.reshape(TH * Wo, C1).astype(jnp.bfloat16)
        z = jnp.dot(lhs, wp_ref[...], preferred_element_type=jnp.float32)
        z = _hardswish(z + bp_ref[...])                  # (TH*Wo, Cp2)
        o_ref[0, :, :] = z.astype(o_ref.dtype)

    return kernel


# ------------------------- wrapper (JAX glue) -------------------------

def lc_block(x_nchw, w_dw, g1, be1, m1, v1, w_pw, g2, be2, m2, v2,
             dw_size=3, stride=2, eps=1e-5, pw_rows=1024):
    """LC_Block forward (use_se=False), eval-mode BatchNorm.

    x_nchw: (N, C1, H, W) f32; w_dw: (C1, 1, k, k); w_pw: (C2, C1, 1, 1).
    Returns (N, C2, Ho, Wo) f32.
    """
    # TODO(synk): LC_SEModule (use_se=True branch) and training-mode BN (batch
    # statistics) are not implemented; this is the default use_se=False eval path.
    # TODO(synk): for very large H*W on v7x, row-block the input DMA too (halo blocks)
    # instead of keeping the whole per-batch image resident in VMEM.
    N, C1, H, W = x_nchw.shape
    C2 = w_pw.shape[0]
    k, s = int(dw_size), int(stride)
    p = (k - 1) // 2
    Ho = (H + 2 * p - k) // s + 1
    Wo = (W + 2 * p - k) // s + 1
    hh = -(-(k - 1) // s)                       # halo rows/cols per space-to-depth sub-grid

    TH = _pick_row_tile(Ho, Wo, pw_rows)        # output rows per grid step
    Ho_p = _round_up(Ho, TH)
    n_tiles = Ho_p // TH

    Hq, Wq = Ho_p + hh, Wo + hh                 # sub-grid extents (incl. halo, zero pad)
    Hp, Wp = s * Hq, s * Wq                     # padded spatial extents (>= H+2p, W+2p)
    Cp2 = _round_up(C2, 128)                    # lane-dense output channels

    # ---- single-pass input prep: pad -> (free) split reshape -> transpose + bf16 ----
    xp = jnp.pad(x_nchw, ((0, 0), (0, 0), (p, Hp - H - p), (p, Wp - W - p)))
    x6 = xp.reshape(N, C1, Hq, s, Wq, s)
    x6 = jnp.transpose(x6, (0, 3, 5, 2, 4, 1)).astype(jnp.bfloat16)   # (N, s, s, Hq, Wq, C1)

    # ---- fold eval-mode BN scales into the conv weights ----
    sc1 = g1 / jnp.sqrt(v1 + eps)
    bd = (be1 - m1 * sc1).reshape(1, C1).astype(jnp.float32)
    wd = (jnp.transpose(w_dw[:, 0, :, :], (1, 2, 0)).reshape(k * k, C1)
          * sc1[None, :]).astype(jnp.float32)

    sc2 = g2 / jnp.sqrt(v2 + eps)
    wp = jnp.pad(w_pw[:, :, 0, 0].T * sc2[None, :],
                 ((0, 0), (0, Cp2 - C2))).astype(jnp.bfloat16)        # (C1, Cp2)
    bp = jnp.pad((be2 - m2 * sc2).reshape(1, C2),
                 ((0, 0), (0, Cp2 - C2))).astype(jnp.float32)

    out = pl.pallas_call(
        _make_fused_kernel(k, s, TH, Wo, C1),
        out_shape=jax.ShapeDtypeStruct((N, Ho_p * Wo, Cp2), jnp.float32),
        grid=(N, n_tiles),
        in_specs=[
            pl.BlockSpec((1, s, s, Hq, Wq, C1), lambda n, i: (n, 0, 0, 0, 0, 0)),
            pl.BlockSpec((k * k, C1), lambda n, i: (0, 0)),
            pl.BlockSpec((1, C1), lambda n, i: (0, 0)),
            pl.BlockSpec((C1, Cp2), lambda n, i: (0, 0)),
            pl.BlockSpec((1, Cp2), lambda n, i: (0, 0)),
        ],
        out_specs=pl.BlockSpec((1, TH * Wo, Cp2), lambda n, i: (n, i, 0)),
        compiler_params=pltpu.CompilerParams(
            dimension_semantics=("parallel", "parallel"),
            vmem_limit_bytes=_vmem_limit_bytes()),
    )(x6, wd, bd, wp, bp)

    out = out.reshape(N, Ho_p, Wo, Cp2)[:, :Ho, :, :C2]
    return jnp.transpose(out, (0, 3, 1, 2))     # back to NCHW


# ------------------------- reference (pure JAX) -------------------------

def reference(x, w_dw, g1, be1, m1, v1, w_pw, g2, be2, m2, v2,
              dw_size=3, stride=2, eps=1e-5):
    C1 = x.shape[1]
    p = (dw_size - 1) // 2
    y = lax.conv_general_dilated(
        x, w_dw, window_strides=(stride, stride), padding=((p, p), (p, p)),
        dimension_numbers=('NCHW', 'OIHW', 'NCHW'), feature_group_count=C1)
    sc1 = g1 / jnp.sqrt(v1 + eps)
    bi1 = be1 - m1 * sc1
    y = y * sc1[None, :, None, None] + bi1[None, :, None, None]
    y = y * jnp.clip(y + 3.0, 0.0, 6.0) / 6.0
    z = lax.conv_general_dilated(
        y, w_pw, window_strides=(1, 1), padding=((0, 0), (0, 0)),
        dimension_numbers=('NCHW', 'OIHW', 'NCHW'))
    sc2 = g2 / jnp.sqrt(v2 + eps)
    bi2 = be2 - m2 * sc2
    z = z * sc2[None, :, None, None] + bi2[None, :, None, None]
    z = z * jnp.clip(z + 3.0, 0.0, 6.0) / 6.0
    return z


# ------------------------- main -------------------------

if __name__ == "__main__":
    key = jax.random.PRNGKey(0)
    ks = jax.random.split(key, 11)

    N, C1, C2, H, W = 2, 4, 8, 16, 16
    dw_size, stride = 3, 2

    x = jax.random.normal(ks[0], (N, C1, H, W), dtype=jnp.float32)

    # depthwise conv weight (OIHW, groups=C1) + BN1 affine / running stats
    w_dw = jax.random.normal(ks[1], (C1, 1, dw_size, dw_size), dtype=jnp.float32) * 0.3
    g1 = 1.0 + 0.1 * jax.random.normal(ks[2], (C1,), dtype=jnp.float32)
    be1 = 0.1 * jax.random.normal(ks[3], (C1,), dtype=jnp.float32)
    m1 = 0.1 * jax.random.normal(ks[4], (C1,), dtype=jnp.float32)
    v1 = jax.random.uniform(ks[5], (C1,), dtype=jnp.float32, minval=0.5, maxval=1.5)

    # pointwise 1x1 conv weight + BN2 affine / running stats
    w_pw = jax.random.normal(ks[6], (C2, C1, 1, 1), dtype=jnp.float32) * 0.3
    g2 = 1.0 + 0.1 * jax.random.normal(ks[7], (C2,), dtype=jnp.float32)
    be2 = 0.1 * jax.random.normal(ks[8], (C2,), dtype=jnp.float32)
    m2 = 0.1 * jax.random.normal(ks[9], (C2,), dtype=jnp.float32)
    v2 = jax.random.uniform(ks[10], (C2,), dtype=jnp.float32, minval=0.5, maxval=1.5)

    # pw_rows=32 -> TH=4 so the small demo exercises the multi-row-tile grid path.
    out = lc_block(x, w_dw, g1, be1, m1, v1, w_pw, g2, be2, m2, v2,
                   dw_size=dw_size, stride=stride, pw_rows=32)
    out = jax.block_until_ready(out)

    ref = reference(x, w_dw, g1, be1, m1, v1, w_pw, g2, be2, m2, v2,
                    dw_size=dw_size, stride=stride)
    assert out.shape == (N, C2, H // stride, W // stride), out.shape
    # bf16 activations on both the depthwise input and the MXU lhs -> relaxed tolerance
    np.testing.assert_allclose(np.asarray(out), np.asarray(ref),
                               rtol=3e-2, atol=3e-2)
    print("KERNEL_OK")
</pallas_src>

<mosaic_0001>
module attributes {stable_mosaic.version = 11 : i64} {
  func.func @kernel(%arg0: i32, %arg1: i32, %arg2: memref<1x2x2x9x9x4xbf16, #tpu.memory_space<vmem>>, %arg3: memref<9x4xf32, #tpu.memory_space<vmem>>, %arg4: memref<1x4xf32, #tpu.memory_space<vmem>>, %arg5: memref<4x128xbf16, #tpu.memory_space<vmem>>, %arg6: memref<1x128xf32, #tpu.memory_space<vmem>>, %arg7: memref<1x32x128xf32, #tpu.memory_space<vmem>>) attributes {dimension_semantics = [#tpu.dimension_semantics<parallel>, #tpu.dimension_semantics<parallel>], iteration_bounds = array<i64: 2, 2>, scalar_prefetch = 0 : i64, scratch_operands = 0 : i64, tpu.core_type = #tpu.core_type<tc>, window_params = [{transform_indices = @transform_0, window_bounds = array<i64: 1, 2, 2, 9, 9, 4>}, {pipeline_mode = #tpu.pipeline_mode<synchronous>, transform_indices = @transform_1, window_bounds = array<i64: 9, 4>}, {pipeline_mode = #tpu.pipeline_mode<synchronous>, transform_indices = @transform_2, window_bounds = array<i64: 1, 4>}, {pipeline_mode = #tpu.pipeline_mode<synchronous>, transform_indices = @transform_3, window_bounds = array<i64: 4, 128>}, {pipeline_mode = #tpu.pipeline_mode<synchronous>, transform_indices = @transform_4, window_bounds = array<i64: 1, 128>}, {transform_indices = @transform_5, window_bounds = array<i64: 1, 32, 128>}]} {
    %c4_i32 = arith.constant 4 : i32
    %0 = arith.muli %arg1, %c4_i32 : i32
    %c0_i32 = arith.constant 0 : i32
    %1 = arith.addi %0, %c0_i32 : i32
    %c0 = arith.constant 0 : index
    %c0_0 = arith.constant 0 : index
    %c0_1 = arith.constant 0 : index
    %2 = arith.index_cast %1 : i32 to index
    %c0_2 = arith.constant 0 : index
    %c0_3 = arith.constant 0 : index
    %3 = vector.load %arg2[%c0, %c0_0, %c0_1, %2, %c0_2, %c0_3] : memref<1x2x2x9x9x4xbf16, #tpu.memory_space<vmem>>, vector<1x1x1x4x8x4xbf16>
    %4 = vector.shape_cast %3 : vector<1x1x1x4x8x4xbf16> to vector<4x8x4xbf16>
    %5 = arith.extf %4 : vector<4x8x4xbf16> to vector<4x8x4xf32>
    %c0_4 = arith.constant 0 : index
    %c0_5 = arith.constant 0 : index
    %6 = vector.load %arg3[%c0_4, %c0_5] : memref<9x4xf32, #tpu.memory_space<vmem>>, vector<1x4xf32>
    %7 = vector.shape_cast %6 : vector<1x4xf32> to vector<4xf32>
    %8 = vector.shape_cast %7 : vector<4xf32> to vector<1x1x4xf32>
    %9 = vector.broadcast %8 : vector<1x1x4xf32> to vector<4x8x4xf32>
    %10 = arith.mulf %5, %9 : vector<4x8x4xf32>
    %c0_i32_6 = arith.constant 0 : i32
    %11 = arith.addi %0, %c0_i32_6 : i32
    %c0_7 = arith.constant 0 : index
    %c0_8 = arith.constant 0 : index
    %c1 = arith.constant 1 : index
    %12 = arith.index_cast %11 : i32 to index
    %c0_9 = arith.constant 0 : index
    %c0_10 = arith.constant 0 : index
    %13 = vector.load %arg2[%c0_7, %c0_8, %c1, %12, %c0_9, %c0_10] : memref<1x2x2x9x9x4xbf16, #tpu.memory_space<vmem>>, vector<1x1x1x4x8x4xbf16>
    %14 = vector.shape_cast %13 : vector<1x1x1x4x8x4xbf16> to vector<4x8x4xbf16>
    %15 = arith.extf %14 : vector<4x8x4xbf16> to vector<4x8x4xf32>
    %c1_11 = arith.constant 1 : index
    %c0_12 = arith.constant 0 : index
    %16 = vector.load %arg3[%c1_11, %c0_12] : memref<9x4xf32, #tpu.memory_space<vmem>>, vector<1x4xf32>
    %17 = vector.shape_cast %16 : vector<1x4xf32> to vector<4xf32>
    %18 = vector.shape_cast %17 : vector<4xf32> to vector<1x1x4xf32>
    %19 = vector.broadcast %18 : vector<1x1x4xf32> to vector<4x8x4xf32>
    %20 = arith.mulf %15, %19 : vector<4x8x4xf32>
    %21 = arith.addf %10, %20 : vector<4x8x4xf32>
    %c0_i32_13 = arith.constant 0 : i32
    %22 = arith.addi %0, %c0_i32_13 : i32
    %c0_14 = arith.constant 0 : index
    %c0_15 = arith.constant 0 : index
    %c0_16 = arith.constant 0 : index
    %23 = arith.index_cast %22 : i32 to index
    %c1_17 = arith.constant 1 : index
    %c0_18 = arith.constant 0 : index
    %24 = vector.load %arg2[%c0_14, %c0_15, %c0_16, %23, %c1_17, %c0_18] : memref<1x2x2x9x9x4xbf16, #tpu.memory_space<vmem>>, vector<1x1x1x4x8x4xbf16>
    %25 = vector.shape_cast %24 : vector<1x1x1x4x8x4xbf16> to vector<4x8x4xbf16>
    %26 = arith.extf %25 : vector<4x8x4xbf16> to vector<4x8x4xf32>
    %c2 = arith.constant 2 : index
    %c0_19 = arith.constant 0 : index
    %27 = vector.load %arg3[%c2, %c0_19] : memref<9x4xf32, #tpu.memory_space<vmem>>, vector<1x4xf32>
    %28 = vector.shape_cast %27 : vector<1x4xf32> to vector<4xf32>
    %29 = vector.shape_cast %28 : vector<4xf32> to vector<1x1x4xf32>
    %30 = vector.broadcast %29 : vector<1x1x4xf32> to vector<4x8x4xf32>
    %31 = arith.mulf %26, %30 : vector<4x8x4xf32>
    %32 = arith.addf %21, %31 : vector<4x8x4xf32>
    %c0_i32_20 = arith.constant 0 : i32
    %33 = arith.addi %0, %c0_i32_20 : i32
    %c0_21 = arith.constant 0 : index
    %c1_22 = arith.constant 1 : index
    %c0_23 = arith.constant 0 : index
    %34 = arith.index_cast %33 : i32 to index
    %c0_24 = arith.constant 0 : index
    %c0_25 = arith.constant 0 : index
    %35 = vector.load %arg2[%c0_21, %c1_22, %c0_23, %34, %c0_24, %c0_25] : memref<1x2x2x9x9x4xbf16, #tpu.memory_space<vmem>>, vector<1x1x1x4x8x4xbf16>
    %36 = vector.shape_cast %35 : vector<1x1x1x4x8x4xbf16> to vector<4x8x4xbf16>
    %37 = arith.extf %36 : vector<4x8x4xbf16> to vector<4x8x4xf32>
    %c3 = arith.constant 3 : index
    %c0_26 = arith.constant 0 : index
    %38 = vector.load %arg3[%c3, %c0_26] : memref<9x4xf32, #tpu.memory_space<vmem>>, vector<1x4xf32>
    %39 = vector.shape_cast %38 : vector<1x4xf32> to vector<4xf32>
    %40 = vector.shape_cast %39 : vector<4xf32> to vector<1x1x4xf32>
    %41 = vector.broadcast %40 : vector<1x1x4xf32> to vector<4x8x4xf32>
    %42 = arith.mulf %37, %41 : vector<4x8x4xf32>
    %43 = arith.addf %32, %42 : vector<4x8x4xf32>
    %c0_i32_27 = arith.constant 0 : i32
    %44 = arith.addi %0, %c0_i32_27 : i32
    %c0_28 = arith.constant 0 : index
    %c1_29 = arith.constant 1 : index
    %c1_30 = arith.constant 1 : index
    %45 = arith.index_cast %44 : i32 to index
    %c0_31 = arith.constant 0 : index
    %c0_32 = arith.constant 0 : index
    %46 = vector.load %arg2[%c0_28, %c1_29, %c1_30, %45, %c0_31, %c0_32] : memref<1x2x2x9x9x4xbf16, #tpu.memory_space<vmem>>, vector<1x1x1x4x8x4xbf16>
    %47 = vector.shape_cast %46 : vector<1x1x1x4x8x4xbf16> to vector<4x8x4xbf16>
    %48 = arith.extf %47 : vector<4x8x4xbf16> to vector<4x8x4xf32>
    %c4 = arith.constant 4 : index
    %c0_33 = arith.constant 0 : index
    %49 = vector.load %arg3[%c4, %c0_33] : memref<9x4xf32, #tpu.memory_space<vmem>>, vector<1x4xf32>
    %50 = vector.shape_cast %49 : vector<1x4xf32> to vector<4xf32>
    %51 = vector.shape_cast %50 : vector<4xf32> to vector<1x1x4xf32>
    %52 = vector.broadcast %51 : vector<1x1x4xf32> to vector<4x8x4xf32>
    %53 = arith.mulf %48, %52 : vector<4x8x4xf32>
    %54 = arith.addf %43, %53 : vector<4x8x4xf32>
    %c0_i32_34 = arith.constant 0 : i32
    %55 = arith.addi %0, %c0_i32_34 : i32
    %c0_35 = arith.constant 0 : index
    %c1_36 = arith.constant 1 : index
    %c0_37 = arith.constant 0 : index
    %56 = arith.index_cast %55 : i32 to index
    %c1_38 = arith.constant 1 : index
    %c0_39 = arith.constant 0 : index
    %57 = vector.load %arg2[%c0_35, %c1_36, %c0_37, %56, %c1_38, %c0_39] : memref<1x2x2x9x9x4xbf16, #tpu.memory_space<vmem>>, vector<1x1x1x4x8x4xbf16>
    %58 = vector.shape_cast %57 : vector<1x1x1x4x8x4xbf16> to vector<4x8x4xbf16>
    %59 = arith.extf %58 : vector<4x8x4xbf16> to vector<4x8x4xf32>
    %c5 = arith.constant 5 : index
    %c0_40 = arith.constant 0 : index
    %60 = vector.load %arg3[%c5, %c0_40] : memref<9x4xf32, #tpu.memory_space<vmem>>, vector<1x4xf32>
    %61 = vector.shape_cast %60 : vector<1x4xf32> to vector<4xf32>
    %62 = vector.shape_cast %61 : vector<4xf32> to vector<1x1x4xf32>
    %63 = vector.broadcast %62 : vector<1x1x4xf32> to vector<4x8x4xf32>
    %64 = arith.mulf %59, %63 : vector<4x8x4xf32>
    %65 = arith.addf %54, %64 : vector<4x8x4xf32>
    %c1_i32 = arith.constant 1 : i32
    %66 = arith.addi %0, %c1_i32 : i32
    %c0_41 = arith.constant 0 : index
    %c0_42 = arith.constant 0 : index
    %c0_43 = arith.constant 0 : index
    %67 = arith.index_cast %66 : i32 to index
    %c0_44 = arith.constant 0 : index
    %c0_45 = arith.constant 0 : index
    %68 = vector.load %arg2[%c0_41, %c0_42, %c0_43, %67, %c0_44, %c0_45] : memref<1x2x2x9x9x4xbf16, #tpu.memory_space<vmem>>, vector<1x1x1x4x8x4xbf16>
    %69 = vector.shape_cast %68 : vector<1x1x1x4x8x4xbf16> to vector<4x8x4xbf16>
    %70 = arith.extf %69 : vector<4x8x4xbf16> to vector<4x8x4xf32>
    %c6 = arith.constant 6 : index
    %c0_46 = arith.constant 0 : index
    %71 = vector.load %arg3[%c6, %c0_46] : memref<9x4xf32, #tpu.memory_space<vmem>>, vector<1x4xf32>
    %72 = vector.shape_cast %71 : vector<1x4xf32> to vector<4xf32>
    %73 = vector.shape_cast %72 : vector<4xf32> to vector<1x1x4xf32>
    %74 = vector.broadcast %73 : vector<1x1x4xf32> to vector<4x8x4xf32>
    %75 = arith.mulf %70, %74 : vector<4x8x4xf32>
    %76 = arith.addf %65, %75 : vector<4x8x4xf32>
    %c1_i32_47 = arith.constant 1 : i32
    %77 = arith.addi %0, %c1_i32_47 : i32
    %c0_48 = arith.constant 0 : index
    %c0_49 = arith.constant 0 : index
    %c1_50 = arith.constant 1 : index
    %78 = arith.index_cast %77 : i32 to index
    %c0_51 = arith.constant 0 : index
    %c0_52 = arith.constant 0 : index
    %79 = vector.load %arg2[%c0_48, %c0_49, %c1_50, %78, %c0_51, %c0_52] : memref<1x2x2x9x9x4xbf16, #tpu.memory_space<vmem>>, vector<1x1x1x4x8x4xbf16>
    %80 = vector.shape_cast %79 : vector<1x1x1x4x8x4xbf16> to vector<4x8x4xbf16>
    %81 = arith.extf %80 : vector<4x8x4xbf16> to vector<4x8x4xf32>
    %c7 = arith.constant 7 : index
    %c0_53 = arith.constant 0 : index
    %82 = vector.load %arg3[%c7, %c0_53] : memref<9x4xf32, #tpu.memory_space<vmem>>, vector<1x4xf32>
    %83 = vector.shape_cast %82 : vector<1x4xf32> to vector<4xf32>
    %84 = vector.shape_cast %83 : vector<4xf32> to vector<1x1x4xf32>
    %85 = vector.broadcast %84 : vector<1x1x4xf32> to vector<4x8x4xf32>
    %86 = arith.mulf %81, %85 : vector<4x8x4xf32>
    %87 = arith.addf %76, %86 : vector<4x8x4xf32>
    %c1_i32_54 = arith.constant 1 : i32
    %88 = arith.addi %0, %c1_i32_54 : i32
    %c0_55 = arith.constant 0 : index
    %c0_56 = arith.constant 0 : index
    %c0_57 = arith.constant 0 : index
    %89 = arith.index_cast %88 : i32 to index
    %c1_58 = arith.constant 1 : index
    %c0_59 = arith.constant 0 : index
    %90 = vector.load %arg2[%c0_55, %c0_56, %c0_57, %89, %c1_58, %c0_59] : memref<1x2x2x9x9x4xbf16, #tpu.memory_space<vmem>>, vector<1x1x1x4x8x4xbf16>
    %91 = vector.shape_cast %90 : vector<1x1x1x4x8x4xbf16> to vector<4x8x4xbf16>
    %92 = arith.extf %91 : vector<4x8x4xbf16> to vector<4x8x4xf32>
    %c8 = arith.constant 8 : index
    %c0_60 = arith.constant 0 : index
    %93 = vector.load %arg3[%c8, %c0_60] : memref<9x4xf32, #tpu.memory_space<vmem>>, vector<1x4xf32>
    %94 = vector.shape_cast %93 : vector<1x4xf32> to vector<4xf32>
    %95 = vector.shape_cast %94 : vector<4xf32> to vector<1x1x4xf32>
    %96 = vector.broadcast %95 : vector<1x1x4xf32> to vector<4x8x4xf32>
    %97 = arith.mulf %92, %96 : vector<4x8x4xf32>
    %98 = arith.addf %87, %97 : vector<4x8x4xf32>
    %c0_61 = arith.constant 0 : index
    %c0_62 = arith.constant 0 : index
    %99 = vector.load %arg4[%c0_61, %c0_62] : memref<1x4xf32, #tpu.memory_space<vmem>>, vector<1x4xf32>
    %100 = vector.shape_cast %99 : vector<1x4xf32> to vector<4xf32>
    %101 = vector.shape_cast %100 : vector<4xf32> to vector<1x1x4xf32>
    %102 = vector.broadcast %101 : vector<1x1x4xf32> to vector<4x8x4xf32>
    %103 = arith.addf %98, %102 : vector<4x8x4xf32>
    %cst = arith.constant 3.000000e+00 : f32
    %104 = vector.broadcast %cst : f32 to vector<4x8x4xf32>
    %105 = arith.addf %103, %104 : vector<4x8x4xf32>
    %cst_63 = arith.constant 0.000000e+00 : f32
    %106 = vector.broadcast %cst_63 : f32 to vector<4x8x4xf32>
    %107 = arith.maximumf %105, %106 : vector<4x8x4xf32>
    %cst_64 = arith.constant 6.000000e+00 : f32
    %108 = vector.broadcast %cst_64 : f32 to vector<4x8x4xf32>
    %109 = arith.minimumf %107, %108 : vector<4x8x4xf32>
    %110 = arith.mulf %103, %109 : vector<4x8x4xf32>
    %cst_65 = arith.constant 0.166666672 : f32
    %111 = vector.broadcast %cst_65 : f32 to vector<4x8x4xf32>
    %112 = arith.mulf %110, %111 : vector<4x8x4xf32>
    %113 = vector.shape_cast %112 : vector<4x8x4xf32> to vector<32x4xf32>
    %114 = arith.truncf %113 : vector<32x4xf32> to vector<32x4xbf16>
    %c0_66 = arith.constant 0 : index
    %c0_67 = arith.constant 0 : index
    %115 = vector.load %arg5[%c0_66, %c0_67] : memref<4x128xbf16, #tpu.memory_space<vmem>>, vector<4x128xbf16>
    %cst_68 = arith.constant dense<0.000000e+00> : vector<32x128xf32>
    %116 = tpu.matmul %114, %115, %cst_68 {dimension_numbers = #tpu.dot_dimension_numbers<[1], [0], [0], [1], [0, 0, 1, 1], [], []>} : vector<32x4xbf16>, vector<4x128xbf16>, vector<32x128xf32> -> vector<32x128xf32>
    %c0_69 = arith.constant 0 : index
    %c0_70 = arith.constant 0 : index
    %117 = vector.load %arg6[%c0_69, %c0_70] : memref<1x128xf32, #tpu.memory_space<vmem>>, vector<1x128xf32>
    %118 = vector.broadcast %117 : vector<1x128xf32> to vector<32x128xf32>
    %119 = arith.addf %116, %118 : vector<32x128xf32>
    %cst_71 = arith.constant 3.000000e+00 : f32
    %120 = vector.broadcast %cst_71 : f32 to vector<32x128xf32>
    %121 = arith.addf %119, %120 : vector<32x128xf32>
    %cst_72 = arith.constant 0.000000e+00 : f32
    %122 = vector.broadcast %cst_72 : f32 to vector<32x128xf32>
    %123 = arith.maximumf %121, %122 : vector<32x128xf32>
    %cst_73 = arith.constant 6.000000e+00 : f32
    %124 = vector.broadcast %cst_73 : f32 to vector<32x128xf32>
    %125 = arith.minimumf %123, %124 : vector<32x128xf32>
    %126 = arith.mulf %119, %125 : vector<32x128xf32>
    %cst_74 = arith.constant 0.166666672 : f32
    %127 = vector.broadcast %cst_74 : f32 to vector<32x128xf32>
    %128 = arith.mulf %126, %127 : vector<32x128xf32>
    %c0_75 = arith.constant 0 : index
    %c0_76 = arith.constant 0 : index
    %c0_77 = arith.constant 0 : index
    %129 = vector.load %arg7[%c0_75, %c0_76, %c0_77] : memref<1x32x128xf32, #tpu.memory_space<vmem>>, vector<1x32x128xf32>
    %130 = vector.shape_cast %129 : vector<1x32x128xf32> to vector<32x128xf32>
    %131 = vector.shape_cast %128 : vector<32x128xf32> to vector<1x32x128xf32>
    tpu.vector_store %arg7[%c0_75, %c0_76, %c0_77], %131 {strides = array<i32>} : memref<1x32x128xf32, #tpu.memory_space<vmem>>, vector<1x32x128xf32>,
    return
  }
  func.func @transform_0(%arg0: i32, %arg1: i32) -> (i32, i32, i32, i32, i32, i32) {
    %c0_i32 = arith.constant 0 : i32
    %c0_i32_0 = arith.constant 0 : i32
    %c0_i32_1 = arith.constant 0 : i32
    %c0_i32_2 = arith.constant 0 : i32
    %c0_i32_3 = arith.constant 0 : i32
    %c0_i32_4 = arith.constant 0 : i32
    return %arg0, %c0_i32, %c0_i32_0, %c0_i32_1, %c0_i32_2, %c0_i32_3 : i32, i32, i32, i32, i32, i32
  }
  func.func @transform_1(%arg0: i32, %arg1: i32) -> (i32, i32) {
    %c0_i32 = arith.constant 0 : i32
    %c0_i32_0 = arith.constant 0 : i32
    %c0_i32_1 = arith.constant 0 : i32
    return %c0_i32, %c0_i32_0 : i32, i32
  }
  func.func @transform_2(%arg0: i32, %arg1: i32) -> (i32, i32) {
    %c0_i32 = arith.constant 0 : i32
    %c0_i32_0 = arith.constant 0 : i32
    %c0_i32_1 = arith.constant 0 : i32
    return %c0_i32, %c0_i32_0 : i32, i32
  }
  func.func @transform_3(%arg0: i32, %arg1: i32) -> (i32, i32) {
    %c0_i32 = arith.constant 0 : i32
    %c0_i32_0 = arith.constant 0 : i32
    %c0_i32_1 = arith.constant 0 : i32
    return %c0_i32, %c0_i32_0 : i32, i32
  }
  func.func @transform_4(%arg0: i32, %arg1: i32) -> (i32, i32) {
    %c0_i32 = arith.constant 0 : i32
    %c0_i32_0 = arith.constant 0 : i32
    %c0_i32_1 = arith.constant 0 : i32
    return %c0_i32, %c0_i32_0 : i32, i32
  }
  func.func @transform_5(%arg0: i32, %arg1: i32) -> (i32, i32, i32) {
    %c0_i32 = arith.constant 0 : i32
    %c0_i32_0 = arith.constant 0 : i32
    return %arg0, %arg1, %c0_i32 : i32, i32, i32
  }
}

</mosaic_0001>

<bundles_post_ra>
// kernel: tpu_custom_call.1
= control target key start
LH: loop header
LB: loop body
LE: loop exit
PB: predicated region body
PF: predicated region fallthrough
CT: control target
= control target key end

     0   :  { %10 = vsyncpa [#allocation3], 0  ;;  %s1349_s0 = inlined_call_operand.vmem [shape: bf16[2,2,2,9,9,4], index: 0, kind: input, shape index: {}]   ;;  %s1350_s1 = inlined_call_operand.vmem [shape: f32[9,4], index: 1, kind: input, shape index: {}]   ;;  %s1351_s2 = inlined_call_operand.vmem [shape: f32[1,4], index: 2, kind: input, shape index: {}]   ;;  %s1352_s3 = inlined_call_operand.vmem [shape: bf16[4,128], index: 3, kind: input, shape index: {}]   ;;  %s1353_s4 = inlined_call_operand.vmem [shape: f32[1,128], index: 4, kind: input, shape index: {}]   ;;  %s1354_s5 = inlined_call_operand.hbm [shape: f32[2,64,128], index: 5, kind: output, shape index: {}]  }
   0x1   :  { %12 = vsyncpa [#allocation3 + $0x1], 0  ;;  %s1058_s18 = smov 0   ;;  %s1060_s19 = smov 0  }
   0x2   :  { %s1062_s20 = smov 0   ;;  %s1064_s21 = smov 0  }
   0x3   :  { %s1066_s22 = smov 0   ;;  %s1068_s23 = smov 0  }
   0x4   :  { %s1070_s24 = smov 0   ;;  %s1072_s25 = smov 0  }
   0x5 LB: > { %s769_s26 = sadd.s32 4294967295, %s1023_s25   ;;  %s770_s27 = sadd.s32 4294967294, %s1023_s25   ;;  %s1023_s25 = sphi %s1072_s25, %s18_s25   ;;  %s1019_s24 = sphi %s1070_s24, %s1363_s24   ;;  %s1015_s23 = sphi %s1068_s23, %s1362_s23   ;;  %s1011_s22 = sphi %s1066_s22, %s1361_s22   ;;  %s1007_s21 = sphi %s1064_s21, %s1360_s21   ;;  %s1003_s20 = sphi %s1062_s20, %s1359_s20   ;;  %s999_s19 = sphi %s1060_s19, %s1358_s19   ;;  %s995_s18 = sphi %s1058_s18, %s1357_s18  }
   0x6   : > { %s27_s28 = sadd.s32 1, %s1015_s23  ;;  %s30_s29 = sadd.s32 1, %s1019_s24 }
   0x7   : > { %p28_p0 = scmp.ge.s32.totalorder %s27_s28, 2  ;;  %p159_p1 = scmp.ne.s32.totalorder %s1003_s20, %s999_s19 }
   0x8   : > { %p160_p2 = scmp.eq.s32.totalorder %s769_s26, 3  ;;  %p165_p5 = scmp.ne.s32.totalorder %s999_s19, %s995_s18 }
   0x9   : > { %s1365_s28 = smov (%p28_p0, %s27_s28), 0  ;;  %s1367_s29 = smov (!%p28_p0, %s30_s29), %s1019_s24 }
   0xa   : > { %s145_s30 = ssub.s32 %s1015_s23, %s1365_s28  ;;  %p1109_p3 = por %p160_p2, %p159_p1 }
   0xb   : > { %p32_p4 = scmp.ge.s32.totalorder %s1367_s29, 2  ;;  %p166_p6 = scmp.eq.s32.totalorder %s770_s27, 3 }
   0xc   : > { %p773_p7 = scmp.ge.s32.totalorder %s1023_s25, 1  ;;  %p204_p9 = scmp.lt.s32.totalorder %s1023_s25, 5 }
   0xd   : > { %s1369_s29 = smov (%p32_p4, %s1367_s29), 0  ;;  %p1118_p8 = por %p166_p6, %p165_p5 }
   0xe   : > { %s144_s8 = ssub.s32 %s1019_s24, %s1369_s29  ;;  %s149_s9 = sadd.s32 1, %s1003_s20 }
   0xf   : > { %s146_s10 = sor.u32 %s145_s30, %s144_s8  ;;  %p205_p10 = pnand %p773_p7, %p204_p9 }
  0x10   : > { %p147_p11 = scmp.eq.s32.totalorder %s146_s10, 0  ;;  %v562_v0 = vld [vmem:[%s1352_s3] sm:$0x3] (!%p205_p10)  ;;  %vm577_vm0 = vcmask (!%p205_p10), 1041408   ;;  %p232_p12 = scmp.lt.s32.totalorder (!%p205_p10), %s1011_s22, 1  ;;  %vm313_vm1 = vcmask (!%p205_p10), 1046528  }
  0x11   : > { %208 = sbr.rel (%p205_p10) target bundleno = 333 (0x14d), region = 40  ;;  %854 = vmatprep.subr.msk.bf16.mxu0 (!%p205_p10), %vm577_vm0, %v562_v0  ;;  %v579_v1 = vsel (!%p205_p10), %vm577_vm0, %v562_v0, 0  ;;  %s838_s16 = sshll.u32 (!%p205_p10), %s1007_s21, 5  ;;  %v1143_v2 = vld [vmem:[%s1350_s1] ss:$0 sm:$0xff] (!%p205_p10)  ;;  %vm570_vm2 = vcmask (!%p205_p10), 31744  }
  0x12   : > { %s1127_s11 = scalar_select %p147_p11, %s1003_s20, %s149_s9  }
  0x13   : > { %849 = vmatpush3.bf16.msra.mxu0 (!%p205_p10), %v579_v1  ;;  %v1148_v3 = vld [vmem:[%s1350_s1 + $0x1] ss:$0 sm:$0xff] (!%p205_p10)  ;;  %v1157_v12 = vld [vmem:[%s1350_s1 + $0x2] ss:$0 sm:$0xff] (!%p205_p10)  ;;  %v1163_v18 = vld [vmem:[%s1350_s1 + $0x3] ss:$0 sm:$0xff] (!%p205_p10) }
  0x14   : > { %v1181_v34 = vld [vmem:[%s1350_s1 + $0x5] ss:$0 sm:$0xff] (!%p205_p10)  ;;  %v1186_v39 = vld [vmem:[%s1350_s1 + $0x4] ss:$0 sm:$0xff] (!%p205_p10)  ;;  %v1201_v58 = vld [vmem:[%s1350_s1 + $0x6] ss:$0 sm:$0xff] (!%p205_p10) }
  0x15   : > { %v1206_v63 = vld [vmem:[%s1350_s1 + $0x7] ss:$0 sm:$0xff] (!%p205_p10)  ;;  %s832_s8 = sshll.u32 (!%p205_p10), %s1007_s21, 2  ;;  %s833_s9 = sshll.u32 (!%p205_p10), %s1011_s22, 3 }
  0x16   : > { %s667_s12 = sadd.s32 (!%p205_p10), %s833_s9, %s832_s8  ;;  %s1025_s26 = smov (!%p205_p10), [#allocation2]  }
  0x17   : > { %s834_s21 = sshll.u32 (!%p205_p10), %s667_s12, 7  ;;  %s933_s8 = sshll.u32 (!%p205_p10), %s1025_s26, 4  ;;  %s934_s8 = int_to_ptr.vmem [resolvable:$false] %s933_s8 }
  0x18   : > { %s233_s14 = scalar_select %p232_p12, %s1011_s22, 1 }
  0x19   : > { %s935_s9 = scalar_lea.vmem %s934_s8, 1024 }
  0x1a   : > { %s855_s15 = smul.u32 288, %s233_s14 }
  0x1c   : > { %s236_s27 = scalar_lea.vmem %s1349_s0, %s855_s15 }
  0x1d   : > { %s1138_s30 = scalar_lea.vmem %s236_s27, %s838_s16  ;;  %s229_s27 = sand.u32 1, %s999_s19  }
  0x1e   : > { %v243_v4 = vld [vmem:[%s1138_s30] ss:$8 sps:$4 sm:$0xff]   ;;  %v284_v6 = vld [vmem:[%s1138_s30 + $0x4] sm:$0x1]  ;;  %v285_v11 = vld [vmem:[%s1138_s30 + $0xc] sm:$0x1]  ;;  %s1293_s16 = scalar_lea.hbm %s1354_s5, %s834_s21 }
  0x1f   : > { %v782_v5 = vld [vmem:[%s1138_s30 + $0x48] ss:$8 sps:$4 sm:$0xff]   ;;  %v247_v7 = vunpack.c.l.bf16 %v243_v4  ;;  %v248_v8 = vunpack.c.h.bf16 %v243_v4  ;;  %v288_v14 = vunpack.c.l.bf16 %v284_v6  ;;  %v289_v15 = vunpack.c.l.bf16 %v285_v11  ;;  %v797_v27 = vld [vmem:[%s1138_s30 + $0xd8] ss:$8 sps:$4 sm:$0xff]   ;;  %v802_v28 = vld [vmem:[%s1138_s30 + $0x94] sm:$0x1] }
  0x20   : > { %v267_v9 = vunpack.c.l.bf16 %v782_v5  ;;  %v268_v10 = vunpack.c.h.bf16 %v782_v5  ;;  %v790_v13 = vld [vmem:[%s1138_s30 + $0x90] ss:$8 sps:$4 sm:$0xff]   ;;  %v803_v29 = vld [vmem:[%s1138_s30 + $0x9c] sm:$0x1]  ;;  %v365_v40 = vunpack.c.l.bf16 %v797_v27  ;;  %v366_v41 = vunpack.c.h.bf16 %v797_v27  ;;  %v822_v6 = vld [vmem:[%s1138_s30 + $0xc] sm:$0x1] }
  0x21   : > { %v341_v16 = vunpack.c.l.bf16 %v790_v13  ;;  %v342_v17 = vunpack.c.h.bf16 %v790_v13  ;;  %v256_v19 = vmul.f32 %v1143_v2, %v247_v7  ;;  %v257_v20 = vmul.f32 %v1143_v2, %v248_v8  ;;  %v809_v48 = vld [vmem:[%s1138_s30 + $0x8] ss:$8 sps:$4 sm:$0xff]   ;;  %s774_s10 = sshll.u32 %s229_s27, 5  ;;  %s1297_s17 = scalar_lea.sflag [#allocation3], %s229_s27 }
  0x22   : > { %v276_v21 = vmul.f32 %v1148_v3, %v267_v9  ;;  %v277_v22 = vmul.f32 %v1148_v3, %v268_v10  ;;  %v297_v23 = vmul.f32 %v1157_v12, %v247_v7  ;;  %v298_v24 = vmul.f32 %v1157_v12, %v288_v14  ;;  %v817_v53 = vld [vmem:[%s1138_s30 + $0x50] ss:$8 sps:$4 sm:$0xff]   ;;  %v823_v7 = vld [vmem:[%s1138_s30 + $0x14] sm:$0x1]  ;;  %v1215_v13 = vld [vmem:[%s1350_s1 + $0x8] ss:$0 sm:$0xff] }
  0x23   : > { %v299_v25 = vmul.f32 %v1157_v12, %v248_v8  ;;  %v300_v26 = vmul.f32 %v1157_v12, %v289_v15  ;;  %v350_v32 = vmul.f32 %v1163_v18, %v341_v16  ;;  %v351_v33 = vmul.f32 %v1163_v18, %v342_v17  ;;  %v245_v14 = vld [vmem:[%s1138_s30 + $0x10] ss:$8 sps:$4 sm:$0xff]   ;;  %s231_s13 = scalar_lea.vmem [#allocation2], %s774_s10 }
  0x24   : > { %v280_v30 = vadd.f32 %v276_v21, %v256_v19  ;;  %v281_v31 = vadd.f32 %v277_v22, %v257_v20  ;;  %v314_v35 = vrot.slane %v297_v23, 1  ;;  %v315_v36 = vrot.slane %v298_v24, 1  ;;  %s670_s14 = sshll.u32 %s231_s13, 4  ;;  %s1288_s14 = int_to_ptr.vmem [resolvable:$true] %s670_s14 }
  0x25   : > { %v317_v37 = vrot.slane %v299_v25, 1  ;;  %v318_v38 = vrot.slane %v300_v26, 1  ;;  %v386_v42 = vunpack.c.l.bf16 %v802_v28  ;;  %v387_v43 = vunpack.c.l.bf16 %v803_v29  ;;  %p936_p2 = scmp.lt.s32.totalorder %s1288_s14, %s934_s8 }
  0x26   : > { %v316_v44 = vsel %vm313_vm1, %v314_v35, %v315_v36  ;;  %v395_v46 = vmul.f32 %v1181_v34, %v341_v16  ;;  %v397_v47 = vmul.f32 %v1181_v34, %v342_v17  ;;  %v374_v51 = vmul.f32 %v1186_v39, %v365_v40  ;;  %v287_v35 = vld [vmem:[%s1138_s30 + $0x1c] sm:$0x1] }
  0x27   : > { %v319_v45 = vsel %vm313_vm1, %v317_v37, %v318_v38  ;;  %v330_v49 = vadd.f32 %v316_v44, %v280_v30  ;;  %v375_v52 = vmul.f32 %v1186_v39, %v366_v41  ;;  %v396_v54 = vmul.f32 %v1181_v34, %v386_v42 }
  0x28   : > { %v331_v50 = vadd.f32 %v319_v45, %v281_v31  ;;  %v398_v55 = vmul.f32 %v1181_v34, %v387_v43  ;;  %v411_v56 = vrot.slane %v395_v46, 1  ;;  %v414_v57 = vrot.slane %v397_v47, 1 }
  0x29   : > { %v354_v59 = vadd.f32 %v350_v32, %v330_v49  ;;  %v439_v61 = vunpack.c.l.bf16 %v809_v48  ;;  %v440_v62 = vunpack.c.h.bf16 %v809_v48  ;;  %v412_v0 = vrot.slane %v396_v54, 1  ;;  %v784_v32 = vld [vmem:[%s1138_s30 + $0x58] ss:$8 sps:$4 sm:$0xff]  }
  0x2a   : > { %v355_v60 = vadd.f32 %v351_v33, %v331_v50  ;;  %v415_v1 = vrot.slane %v398_v55, 1  ;;  %v463_v4 = vunpack.c.l.bf16 %v817_v53  ;;  %v464_v5 = vunpack.c.h.bf16 %v817_v53  ;;  %v286_v33 = vld [vmem:[%s1138_s30 + $0x14] sm:$0x1] }
  0x2b   : > { %v378_v8 = vadd.f32 %v374_v51, %v354_v59  ;;  %v448_v10 = vmul.f32 %v1201_v58, %v439_v61  ;;  %v449_v11 = vmul.f32 %v1201_v58, %v440_v62  ;;  %v413_v15 = vsel %vm313_vm1, %v411_v56, %v412_v0  ;;  %v1236_v51 = vld [vmem:[%s1351_s2] ss:$0 sm:$0xff]  ;;  %v799_v0 = vld [vmem:[%s1138_s30 + $0xe8] ss:$8 sps:$4 sm:$0xff]  }
  0x2c   : > { %v379_v9 = vadd.f32 %v375_v52, %v355_v60  ;;  %v416_v16 = vsel %vm313_vm1, %v414_v57, %v415_v1  ;;  %v472_v17 = vmul.f32 %v1206_v63, %v463_v4  ;;  %v473_v19 = vmul.f32 %v1206_v63, %v464_v5  ;;  %v792_v57 = vld [vmem:[%s1138_s30 + $0xa0] ss:$8 sps:$4 sm:$0xff]  }
  0x2d   : > { %v427_v20 = vadd.f32 %v413_v15, %v378_v8  ;;  %v484_v22 = vunpack.c.l.bf16 %v822_v6  ;;  %v485_v23 = vunpack.c.l.bf16 %v823_v7  ;;  %v493_v24 = vmul.f32 %v1215_v13, %v439_v61 }
  0x2e   : > { %v428_v21 = vadd.f32 %v416_v16, %v379_v9  ;;  %v495_v25 = vmul.f32 %v1215_v13, %v440_v62  ;;  %v249_v26 = vunpack.c.l.bf16 %v245_v14  ;;  %v250_v27 = vunpack.c.h.bf16 %v245_v14  ;;  %v805_v16 = vld [vmem:[%s1138_s30 + $0xac] sm:$0x1] }
  0x2f   : > { %v452_v28 = vadd.f32 %v448_v10, %v427_v20  ;;  %v494_v30 = vmul.f32 %v1215_v13, %v484_v22  ;;  %v496_v31 = vmul.f32 %v1215_v13, %v485_v23  ;;  %v509_v36 = vrot.slane %v493_v24, 1 }
  0x30   : > { %v453_v29 = vadd.f32 %v449_v11, %v428_v21  ;;  %v512_v37 = vrot.slane %v495_v25, 1  ;;  %v258_v38 = vmul.f32 %v1143_v2, %v249_v26  ;;  %v259_v40 = vmul.f32 %v1143_v2, %v250_v27 }
  0x31   : > { %v476_v41 = vadd.f32 %v472_v17, %v452_v28  ;;  %v510_v43 = vrot.slane %v494_v30, 1  ;;  %v513_v44 = vrot.slane %v496_v31, 1  ;;  %v269_v45 = vunpack.c.l.bf16 %v784_v32 }
  0x32   : > { %v477_v42 = vadd.f32 %v473_v19, %v453_v29  ;;  %v270_v46 = vunpack.c.h.bf16 %v784_v32  ;;  %v290_v47 = vunpack.c.l.bf16 %v286_v33  ;;  %v291_v48 = vunpack.c.l.bf16 %v287_v35 }
  0x33   : > { %v511_v49 = vsel %vm313_vm1, %v509_v36, %v510_v43  ;;  %v514_v50 = vsel %vm313_vm1, %v512_v37, %v513_v44  ;;  %v301_v2 = vmul.f32 %v1157_v12, %v249_v26  ;;  %v303_v52 = vmul.f32 %v1157_v12, %v250_v27  ;;  %v819_v43 = vld [vmem:[%s1138_s30 + $0x60] ss:$8 sps:$4 sm:$0xff]  }
  0x34   : > { %v525_v53 = vadd.f32 %v511_v49, %v476_v41  ;;  %v526_v54 = vadd.f32 %v514_v50, %v477_v42  ;;  %v278_v55 = vmul.f32 %v1148_v3, %v269_v45  ;;  %v279_v56 = vmul.f32 %v1148_v3, %v270_v46 }
  0x35   : > { %v302_v59 = vmul.f32 %v1157_v12, %v290_v47  ;;  %v304_v60 = vmul.f32 %v1157_v12, %v291_v48  ;;  %v320_v61 = vrot.slane %v301_v2, 1  ;;  %v323_v62 = vrot.slane %v303_v52, 1  ;;  %v804_v12 = vld [vmem:[%s1138_s30 + $0xa4] sm:$0x1]  ;;  %v824_v52 = vld [vmem:[%s1138_s30 + $0x1c] sm:$0x1] }
  0x36   : > { %v536_v1 = vadd.f32 %v1236_v51, %v525_v53  ;;  %v537_v4 = vadd.f32 %v1236_v51, %v526_v54  ;;  %v282_v5 = vadd.f32 %v278_v55, %v258_v38  ;;  %v283_v6 = vadd.f32 %v279_v56, %v259_v40  ;;  %v811_v38 = vld [vmem:[%s1138_s30 + $0x18] ss:$8 sps:$4 sm:$0xff]   ;;  %v825_v56 = vld [vmem:[%s1138_s30 + $0x24] sm:$0x1]  ;;  %s929_s30 = scalar_lea.vmem %s1288_s14, 512 }
  0x37   : > { %v321_v7 = vrot.slane %v302_v59, 1  ;;  %v324_v8 = vrot.slane %v304_v60, 1  ;;  %v343_v9 = vunpack.c.l.bf16 %v792_v57  ;;  %v344_v3 = vunpack.c.h.bf16 %v792_v57  ;;  %p930_p13 = scmp.ne.s32.totalorder %s1288_s14, %s929_s30  ;;  %p937_p4 = scmp.lt.s32.totalorder %s935_s9, %s929_s30 }
  0x38   : > { %v540_v10 = vadd.f32 3.0, %v536_v1  ;;  %v541_v11 = vadd.f32 3.0, %v537_v4  ;;  %v367_v14 = vunpack.c.l.bf16 %v799_v0  ;;  %v368_v15 = vunpack.c.h.bf16 %v799_v0 }
  0x39   : > { %v322_v17 = vsel %vm313_vm1, %v320_v61, %v321_v7  ;;  %v325_v19 = vsel %vm313_vm1, %v323_v62, %v324_v8  ;;  %v352_v20 = vmul.f32 %v1163_v18, %v343_v9  ;;  %v353_v21 = vmul.f32 %v1163_v18, %v344_v3  ;;  %p931_p0 = pnand %p930_p13, %p1109_p3  ;;  %p938_p5 = por %p937_p4, %p936_p2 }
  0x3a   : > { %v544_v22 = vmax.f32 %v540_v10, 0.0  ;;  %v545_v23 = vmax.f32 %v541_v11, 0.0  ;;  %v332_v24 = vadd.f32 %v322_v17, %v282_v5  ;;  %v333_v25 = vadd.f32 %v325_v19, %v283_v6 }
  0x3b   : > { %v376_v26 = vmul.f32 %v1186_v39, %v367_v14  ;;  %v377_v27 = vmul.f32 %v1186_v39, %v368_v15  ;;  %v388_v28 = vunpack.c.l.bf16 %v804_v12  ;;  %v389_v29 = vunpack.c.l.bf16 %v805_v16  ;;  %p932_p1 = pneg %p931_p0 }
  0x3c   : > { %v548_v30 = vmin.f32 %v544_v22, 6.0  ;;  %v549_v31 = vmin.f32 %v545_v23, 6.0  ;;  %v356_v32 = vadd.f32 %v352_v20, %v332_v24  ;;  %v357_v33 = vadd.f32 %v353_v21, %v333_v25 }
  0x3d   : > { %v399_v35 = vmul.f32 %v1181_v34, %v343_v9  ;;  %v400_v18 = vmul.f32 %v1181_v34, %v388_v28  ;;  %v401_v36 = vmul.f32 %v1181_v34, %v344_v3  ;;  %v402_v37 = vmul.f32 %v1181_v34, %v389_v29  ;;  %p939_p6 = pnand %p938_p5, %p932_p1 }
  0x3e   : > { %v552_v40 = vmul.f32 %v548_v30, %v536_v1  ;;  %v553_v41 = vmul.f32 %v549_v31, %v537_v4  ;;  %v380_v39 = vadd.f32 %v376_v26, %v356_v32  ;;  %v381_v42 = vadd.f32 %v377_v27, %v357_v33 }
  0x3f   : > { %v417_v44 = vrot.slane %v399_v35, 1  ;;  %v418_v45 = vrot.slane %v400_v18, 1  ;;  %v420_v46 = vrot.slane %v401_v36, 1  ;;  %v421_v47 = vrot.slane %v402_v37, 1 }
  0x40   : > { %v556_v48 = vmul.f32 0.16666667, %v552_v40  ;;  %v557_v49 = vmul.f32 0.16666667, %v553_v41  ;;  %v441_v50 = vunpack.c.l.bf16 %v811_v38  ;;  %v442_v2 = vunpack.c.h.bf16 %v811_v38 }
  0x41   : > { %v419_v53 = vsel %vm313_vm1, %v417_v44, %v418_v45  ;;  %v422_v34 = vsel %vm313_vm1, %v420_v46, %v421_v47  ;;  %v465_v54 = vunpack.c.l.bf16 %v819_v43  ;;  %v466_v55 = vunpack.c.h.bf16 %v819_v43 }
  0x42   : > { %v560_v57 = vpack.c.bf16 %v557_v49, %v556_v48  ;;  %v429_v59 = vadd.f32 %v419_v53, %v380_v39  ;;  %v430_v60 = vadd.f32 %v422_v34, %v381_v42  ;;  %v450_v61 = vmul.f32 %v1201_v58, %v441_v50 }
  0x43   : > { %v451_v62 = vmul.f32 %v1201_v58, %v442_v2  ;;  %v474_v0 = vmul.f32 %v1206_v63, %v465_v54  ;;  %v475_v1 = vmul.f32 %v1206_v63, %v466_v55  ;;  %v486_v4 = vunpack.c.l.bf16 %v824_v52 }
  0x44   : > { %850 = vmatprep.mubr.msk.bf16.mxu0 %vm570_vm2, %v560_v57  ;;  %v454_v5 = vadd.f32 %v450_v61, %v429_v59  ;;  %v487_v6 = vunpack.c.l.bf16 %v825_v56  ;;  %v497_v7 = vmul.f32 %v1215_v13, %v441_v50  ;;  %v499_v8 = vmul.f32 %v1215_v13, %v442_v2 }
  0x45   : > { %v455_v9 = vadd.f32 %v451_v62, %v430_v60  ;;  %v498_v3 = vmul.f32 %v1215_v13, %v486_v4 }
  0x46   : > { %v478_v10 = vadd.f32 %v474_v0, %v454_v5  ;;  %v500_v11 = vmul.f32 %v1215_v13, %v487_v6  ;;  %v515_v58 = vrot.slane %v497_v7, 1  ;;  %v518_v14 = vrot.slane %v499_v8, 1 }
  0x47   : > { %v479_v15 = vadd.f32 %v475_v1, %v455_v9  ;;  %v516_v12 = vrot.slane %v498_v3, 1 }
  0x48   : > { %v519_v63 = vrot.slane %v500_v11, 1 }
  0x49   : > { %v517_v16 = vsel %vm313_vm1, %v515_v58, %v516_v12 }
  0x4a   : > { %v520_v17 = vsel %vm313_vm1, %v518_v14, %v519_v63  ;;  %v527_v19 = vadd.f32 %v517_v16, %v478_v10 }
  0x4b   : > { %v528_v20 = vadd.f32 %v520_v17, %v479_v15 }
  0x4c   : > { %v538_v21 = vadd.f32 %v1236_v51, %v527_v19 }
  0x4d   : > { %v539_v22 = vadd.f32 %v1236_v51, %v528_v20  ;;  %v828_v51 = vld [vmem:[%s1353_s4] ss:$0 sm:$0xff] }
  0x4e   : > { %v542_v23 = vadd.f32 3.0, %v538_v21 }
  0x4f   : > { %v543_v24 = vadd.f32 3.0, %v539_v22 }
  0x50   : > { %v546_v25 = vmax.f32 %v542_v23, 0.0 }
  0x51   : > { %v547_v13 = vmax.f32 %v543_v24, 0.0 }
  0x52   : > { %v550_v26 = vmin.f32 %v546_v25, 6.0 }
  0x53   : > { %v551_v27 = vmin.f32 %v547_v13, 6.0 }
  0x54   : > { %v554_v28 = vmul.f32 %v550_v26, %v538_v21 }
  0x55   : > { %v555_v29 = vmul.f32 %v551_v27, %v539_v22 }
  0x56   : > { %v558_v30 = vmul.f32 0.16666667, %v554_v28 }
  0x57   : > { %v559_v31 = vmul.f32 0.16666667, %v555_v29 }
  0x59   : > { %v561_v32 = vpack.c.bf16 %v559_v31, %v558_v30 }
  0x5b   : > { %851 = vmatmul.mubr.msk.bf16.vlgmr.msra.gmra.mrb[0].mxu0 %vm570_vm2, %v561_v32 }
 0x12e   : > { %v852_v33 = vpop.f32.mrb[0].mxu0 }
 0x12f   : > { %v624_v35 = vadd.f32 %v852_v33, %v828_v51  ;;  %v615_v18 = vpop.f32.mrb[1].mxu0 }
 0x130   : > { %v616_v36 = vadd.f32 %v828_v51, %v615_v18  ;;  %v853_v37 = vpop.f32.mrb[2].mxu0 }
 0x131   : > { %v632_v38 = vadd.f32 3.0, %v624_v35  ;;  %v627_v40 = vadd.f32 %v853_v37, %v828_v51  ;;  %v618_v41 = vpop.f32.mrb[3].mxu0 }
 0x132   : > { %v630_v39 = vadd.f32 3.0, %v616_v36  ;;  %v619_v42 = vadd.f32 %v828_v51, %v618_v41 }
 0x133   : > { %v636_v43 = vmax.f32 %v632_v38, 0.0  ;;  %v633_v44 = vadd.f32 3.0, %v627_v40 }
 0x134   : > { %v634_v45 = vmax.f32 %v630_v39, 0.0  ;;  %v631_v46 = vadd.f32 3.0, %v619_v42 }
 0x135   : > { %v640_v47 = vmin.f32 %v636_v43, 6.0  ;;  %v637_v48 = vmax.f32 %v633_v44, 0.0 }
 0x136   : > { %v638_v49 = vmin.f32 %v634_v45, 6.0  ;;  %v635_v50 = vmax.f32 %v631_v46, 0.0 }
 0x137   : > { %v644_v2 = vmul.f32 %v640_v47, %v624_v35  ;;  %v641_v52 = vmin.f32 %v637_v48, 6.0 }
 0x138   : > { %v642_v53 = vmul.f32 %v638_v49, %v616_v36  ;;  %v639_v34 = vmin.f32 %v635_v50, 6.0 }
 0x139   : > { %v648_v54 = vmul.f32 0.16666667, %v644_v2  ;;  %v645_v55 = vmul.f32 %v641_v52, %v627_v40 }
 0x13a   : > { %v646_v56 = vmul.f32 0.16666667, %v642_v53  ;;  %v643_v57 = vmul.f32 %v639_v34, %v619_v42 }
 0x13b   : > { %652 = vst [vmem:[%s231_s13 + $0x10] sm:$0xff] %v648_v54  ;;  %v649_v59 = vmul.f32 0.16666667, %v645_v55 }
 0x13c   : > { %650 = vst [vmem:[%s231_s13] sm:$0xff] %v646_v56  ;;  %v647_v60 = vmul.f32 0.16666667, %v643_v57 }
 0x13d   : > { %653 = vst [vmem:[%s231_s13 + $0x18] sm:$0xff] %v649_v59 }
 0x13e   : > { %651 = vst [vmem:[%s231_s13 + $0x8] sm:$0xff] %v647_v60 }
 0x13f   : > { %942 = shalt.err (!%p939_p6)
}
 0x140   : > { %s943_s27 = scalar_lea.hbm %s1293_s16, 512  ;;  %s947_s13 = scalar_lea.hbm %s1354_s5, 2048 }
 0x141   : > { %p944_p7 = scmp.ne.s32.totalorder %s1293_s16, %s943_s27  ;;  %p948_p11 = scmp.lt.u32.totalorder %s1293_s16, %s1354_s5 }
 0x142   : > { %p949_p12 = scmp.lt.u32.totalorder %s947_s13, %s943_s27  ;;  %p951_p0 = scmp.lt.u32.totalorder %s943_s27, %s1293_s16 }
 0x143   : > { %p945_p9 = pnand %p944_p7, %p1109_p3 }
 0x144   : > { %p950_p13 = por %p949_p12, %p948_p11 }
 0x145   : > { %p946_p10 = pneg %p945_p9 }
 0x146   : > { %p952_p1 = por %p951_p0, %p950_p13 }
 0x148   : > { %p953_p2 = pnand %p952_p1, %p946_p10 }
 0x14a   : > { %956 = shalt.err (!%p953_p2)
}
 0x14b   : > { %s1026_s15 = smov 128   ;;  %s1027_s30 = smov 8  }
 0x14c   : > { %856 = dma.vmem_to_hbm [thread:$0]  (%p1109_p3), %s1288_s14, 512, %s1293_s16, %s1297_s17, %s1026_s15, %s1026_s15, %s1027_s30  }
 0x14d PF: > { %p862_p4 = scmp.ge.s32.totalorder %s1023_s25, 2  ;;  %s685_s26 = sand.u32 1, %s995_s18  }
 0x14e   : > { %s686_s8 = scalar_lea.sflag [#allocation3], %s685_s26 }
 0x14f   : > { %p859_p5 = pnand %p862_p4, %p1118_p8 }
 0x151   : > { %990 = dma.done.wait (!%p859_p5), %s686_s8, 512  }
 0x152   : > { %992 = vsyncadd (!%p859_p5), %s686_s8, 4294966784  ;;  %s18_s25 = sadd.s32 1, %s1023_s25   ;;  %s1357_s18 = smov %s999_s19 }
 0x153   : > { %p15_p6 = scmp.ge.s32.totalorder %s18_s25, 6   ;;  %s1358_s19 = smov %s1003_s20 }
 0x154   : > { %s1359_s20 = smov %s1127_s11  ;;  %s1360_s21 = smov %s1015_s23 }
 0x155   : > { %s1361_s22 = smov %s1019_s24  ;;  %s1362_s23 = smov %s1365_s28 }
 0x156   : > { %s1363_s24 = smov %s1369_s29  ;;  %17 = sbr.rel (!%p15_p6) target bundleno = 5 (0x5), region = 81 }
 0x15d   :  { %691 = vsyncpa [#allocation3], 1 }
 0x15e   :  { %693 = vsyncpa [#allocation3 + $0x1], 1 }

</bundles_post_ra>
